<compile_context>
chip_gen: v7x
topology: tpu7x:2x2x1
jax: 0.10.0
libtpu: 0.0.40
codegen_flags: <defaults>
</compile_context>

<pallas_src>
import functools

import jax
import jax.numpy as jnp
from jax import lax
from jax.experimental import pallas as pl
from jax.experimental.pallas import tpu as pltpu


def _round_up(n, m):
    return ((n + m - 1) // m) * m


def _mlp_kernel(x_ref, mask_ref, w1_ref, b1_ref, w2_ref, b2_ref, w3_ref, b3_ref,
                o_ref, *, apply_softmax, training, num_valid_classes):
    # fc1 (bf16 operands, f32 accumulation on the MXU)
    h1 = jnp.dot(x_ref[...], w1_ref[...],
                 preferred_element_type=jnp.float32) + b1_ref[...]

    # dropout(p=0.5): mask holds {0.0, 2.0} == {dropped, kept * 1/(1-p)}
    if training:
        h1 = h1 * mask_ref[...]
    h1 = jnp.maximum(h1, 0.0)                       # relu

    # fc2 + relu
    h2 = jnp.dot(h1.astype(jnp.bfloat16), w2_ref[...],
                 preferred_element_type=jnp.float32) + b2_ref[...]
    h2 = jnp.maximum(h2, 0.0)

    # fc3
    y = jnp.dot(h2.astype(jnp.bfloat16), w3_ref[...],
                preferred_element_type=jnp.float32) + b3_ref[...]

    if apply_softmax:
        # Padded (zero-weight) class columns must not take part in the softmax.
        col = lax.broadcasted_iota(jnp.int32, y.shape, 1)
        y = jnp.where(col < num_valid_classes, y, -jnp.inf)
        y = y - jnp.max(y, axis=-1, keepdims=True)
        e = jnp.exp(y)
        y = e * pl.reciprocal(jnp.sum(e, axis=-1, keepdims=True), approx=True)

    o_ref[...] = y.astype(o_ref.dtype)


def description_classifier_forward(x, params, *, key=None, apply_softmax=False,
                                   training=True, tile_m=512):
    """Fused MLP forward.  x: [batch, num_features] float32."""
    w1, b1, w2, b2, w3, b3 = params
    batch, num_features = x.shape
    hidden1, hidden2 = w1.shape[1], w2.shape[1]
    num_classes = w3.shape[1]

    # Lane-dense padding (multiples of 128).
    f_p = _round_up(num_features, 128)
    h1_p = _round_up(hidden1, 128)
    h2_p = _round_up(hidden2, 128)
    c_p = _round_up(num_classes, 128)

    # Batch tiling: TILE_M multiple of 8 (f32 sublane), grid over batch tiles.
    tile_m = _round_up(max(8, min(tile_m, _round_up(batch, 8))), 8)
    b_p = _round_up(batch, tile_m)
    grid = (b_p // tile_m,)

    def pad2(a, rows, cols):
        return jnp.pad(a, ((0, rows - a.shape[0]), (0, cols - a.shape[1])))

    x_p = pad2(x, b_p, f_p).astype(jnp.bfloat16)
    w1_p = pad2(w1, f_p, h1_p).astype(jnp.bfloat16)
    w2_p = pad2(w2, h1_p, h2_p).astype(jnp.bfloat16)
    w3_p = pad2(w3, h2_p, c_p).astype(jnp.bfloat16)
    b1_p = pad2(b1, 1, h1_p)
    b2_p = pad2(b2, 1, h2_p)
    b3_p = pad2(b3, 1, c_p)

    if training:
        if key is None:
            key = jax.random.PRNGKey(0)
        keep = jax.random.bernoulli(key, 0.5, (b_p, h1_p))
        mask = keep.astype(jnp.float32) * 2.0        # inverted-dropout scale 1/(1-p)
    else:
        mask = jnp.ones((b_p, h1_p), jnp.float32)    # ignored by the kernel

    kernel = functools.partial(_mlp_kernel, apply_softmax=apply_softmax,
                               training=training, num_valid_classes=num_classes)

    tiled = lambda i: (i, 0)       # streamed over batch tiles
    resident = lambda i: (0, 0)    # weights/biases stay resident in VMEM

    flops = int(2 * b_p * (f_p * h1_p + h1_p * h2_p + h2_p * c_p))
    bytes_accessed = int(
        x_p.size * 2 + mask.size * 4 + b_p * c_p * 4
        + (w1_p.size + w2_p.size + w3_p.size) * 2
        + (b1_p.size + b2_p.size + b3_p.size) * 4)
    transcendentals = int(b_p * c_p) if apply_softmax else 0

    y = pl.pallas_call(
        kernel,
        out_shape=jax.ShapeDtypeStruct((b_p, c_p), jnp.float32),
        grid=grid,
        in_specs=[
            pl.BlockSpec((tile_m, f_p), tiled),     # x tile
            pl.BlockSpec((tile_m, h1_p), tiled),    # dropout mask tile
            pl.BlockSpec((f_p, h1_p), resident),    # w1
            pl.BlockSpec((1, h1_p), resident),      # b1
            pl.BlockSpec((h1_p, h2_p), resident),   # w2
            pl.BlockSpec((1, h2_p), resident),      # b2
            pl.BlockSpec((h2_p, c_p), resident),    # w3
            pl.BlockSpec((1, c_p), resident),       # b3
        ],
        out_specs=pl.BlockSpec((tile_m, c_p), tiled),
        compiler_params=pltpu.CompilerParams(
            dimension_semantics=("parallel",),
            vmem_limit_bytes=32 * 1024 * 1024),
        cost_estimate=pl.CostEstimate(flops=flops,
                                      transcendentals=transcendentals,
                                      bytes_accessed=bytes_accessed),
    )(x_p, mask, w1_p, b1_p, w2_p, b2_p, w3_p, b3_p)

    y = y[:batch, :num_classes]
    return jnp.squeeze(y)          # matches .squeeze() in the PyTorch forward


def init_params(key, num_features, hidden_dim1, hidden_dim2, num_classes):
    """PyTorch nn.Linear-style init (uniform +/- 1/sqrt(fan_in)); W is [in, out]."""
    def linear(key, fan_in, fan_out):
        kw, kb = jax.random.split(key)
        bound = 1.0 / jnp.sqrt(fan_in)
        w = jax.random.uniform(kw, (fan_in, fan_out), jnp.float32, -bound, bound)
        b = jax.random.uniform(kb, (1, fan_out), jnp.float32, -bound, bound)
        return w, b

    k1, k2, k3 = jax.random.split(key, 3)
    w1, b1 = linear(k1, num_features, hidden_dim1)
    w2, b2 = linear(k2, hidden_dim1, hidden_dim2)
    w3, b3 = linear(k3, hidden_dim2, num_classes)
    return (w1, b1, w2, b2, w3, b3)


if __name__ == "__main__":
    # Small shapes consistent with the module's forward.
    batch, num_features = 8, 32
    hidden_dim1, hidden_dim2, num_classes = 64, 32, 4

    key = jax.random.PRNGKey(0)
    kx, kp, kd = jax.random.split(key, 3)
    x = jax.random.normal(kx, (batch, num_features), dtype=jnp.float32)
    params = init_params(kp, num_features, hidden_dim1, hidden_dim2, num_classes)

    y = description_classifier_forward(x, params, key=kd, apply_softmax=False,
                                       training=True)
    y = jax.block_until_ready(y)
    assert y.shape == (batch, num_classes)
    print("KERNEL_OK")
</pallas_src>

<mosaic_0001>
module attributes {stable_mosaic.version = 11 : i64} {
  func.func @_mlp_kernel(%arg0: i32, %arg1: memref<8x128xbf16, #tpu.memory_space<vmem>>, %arg2: memref<8x128xf32, #tpu.memory_space<vmem>>, %arg3: memref<128x128xbf16, #tpu.memory_space<vmem>>, %arg4: memref<1x128xf32, #tpu.memory_space<vmem>>, %arg5: memref<128x128xbf16, #tpu.memory_space<vmem>>, %arg6: memref<1x128xf32, #tpu.memory_space<vmem>>, %arg7: memref<128x128xbf16, #tpu.memory_space<vmem>>, %arg8: memref<1x128xf32, #tpu.memory_space<vmem>>, %arg9: memref<8x128xf32, #tpu.memory_space<vmem>>) attributes {dimension_semantics = [#tpu.dimension_semantics<parallel>], iteration_bounds = array<i64: 1>, scalar_prefetch = 0 : i64, scratch_operands = 0 : i64, tpu.core_type = #tpu.core_type<tc>, window_params = [{transform_indices = @transform_0, window_bounds = array<i64: 8, 128>}, {transform_indices = @transform_1, window_bounds = array<i64: 8, 128>}, {pipeline_mode = #tpu.pipeline_mode<synchronous>, transform_indices = @transform_2, window_bounds = array<i64: 128, 128>}, {pipeline_mode = #tpu.pipeline_mode<synchronous>, transform_indices = @transform_3, window_bounds = array<i64: 1, 128>}, {pipeline_mode = #tpu.pipeline_mode<synchronous>, transform_indices = @transform_4, window_bounds = array<i64: 128, 128>}, {pipeline_mode = #tpu.pipeline_mode<synchronous>, transform_indices = @transform_5, window_bounds = array<i64: 1, 128>}, {pipeline_mode = #tpu.pipeline_mode<synchronous>, transform_indices = @transform_6, window_bounds = array<i64: 128, 128>}, {pipeline_mode = #tpu.pipeline_mode<synchronous>, transform_indices = @transform_7, window_bounds = array<i64: 1, 128>}, {transform_indices = @transform_8, window_bounds = array<i64: 8, 128>}]} {
    %c0 = arith.constant 0 : index
    %c0_0 = arith.constant 0 : index
    %0 = vector.load %arg1[%c0, %c0_0] : memref<8x128xbf16, #tpu.memory_space<vmem>>, vector<8x128xbf16>
    %c0_1 = arith.constant 0 : index
    %c0_2 = arith.constant 0 : index
    %1 = vector.load %arg3[%c0_1, %c0_2] : memref<128x128xbf16, #tpu.memory_space<vmem>>, vector<128x128xbf16>
    %cst = arith.constant dense<0.000000e+00> : vector<8x128xf32>
    %2 = tpu.matmul %0, %1, %cst {dimension_numbers = #tpu.dot_dimension_numbers<[1], [0], [0], [1], [0, 0, 1, 1], [], []>} : vector<8x128xbf16>, vector<128x128xbf16>, vector<8x128xf32> -> vector<8x128xf32>
    %c0_3 = arith.constant 0 : index
    %c0_4 = arith.constant 0 : index
    %3 = vector.load %arg4[%c0_3, %c0_4] : memref<1x128xf32, #tpu.memory_space<vmem>>, vector<1x128xf32>
    %4 = vector.broadcast %3 : vector<1x128xf32> to vector<8x128xf32>
    %5 = arith.addf %2, %4 : vector<8x128xf32>
    %c0_5 = arith.constant 0 : index
    %c0_6 = arith.constant 0 : index
    %6 = vector.load %arg2[%c0_5, %c0_6] : memref<8x128xf32, #tpu.memory_space<vmem>>, vector<8x128xf32>
    %7 = arith.mulf %5, %6 : vector<8x128xf32>
    %cst_7 = arith.constant 0.000000e+00 : f32
    %8 = vector.broadcast %cst_7 : f32 to vector<8x128xf32>
    %9 = arith.maximumf %7, %8 : vector<8x128xf32>
    %10 = arith.truncf %9 : vector<8x128xf32> to vector<8x128xbf16>
    %c0_8 = arith.constant 0 : index
    %c0_9 = arith.constant 0 : index
    %11 = vector.load %arg5[%c0_8, %c0_9] : memref<128x128xbf16, #tpu.memory_space<vmem>>, vector<128x128xbf16>
    %cst_10 = arith.constant dense<0.000000e+00> : vector<8x128xf32>
    %12 = tpu.matmul %10, %11, %cst_10 {dimension_numbers = #tpu.dot_dimension_numbers<[1], [0], [0], [1], [0, 0, 1, 1], [], []>} : vector<8x128xbf16>, vector<128x128xbf16>, vector<8x128xf32> -> vector<8x128xf32>
    %c0_11 = arith.constant 0 : index
    %c0_12 = arith.constant 0 : index
    %13 = vector.load %arg6[%c0_11, %c0_12] : memref<1x128xf32, #tpu.memory_space<vmem>>, vector<1x128xf32>
    %14 = vector.broadcast %13 : vector<1x128xf32> to vector<8x128xf32>
    %15 = arith.addf %12, %14 : vector<8x128xf32>
    %cst_13 = arith.constant 0.000000e+00 : f32
    %16 = vector.broadcast %cst_13 : f32 to vector<8x128xf32>
    %17 = arith.maximumf %15, %16 : vector<8x128xf32>
    %18 = arith.truncf %17 : vector<8x128xf32> to vector<8x128xbf16>
    %c0_14 = arith.constant 0 : index
    %c0_15 = arith.constant 0 : index
    %19 = vector.load %arg7[%c0_14, %c0_15] : memref<128x128xbf16, #tpu.memory_space<vmem>>, vector<128x128xbf16>
    %cst_16 = arith.constant dense<0.000000e+00> : vector<8x128xf32>
    %20 = tpu.matmul %18, %19, %cst_16 {dimension_numbers = #tpu.dot_dimension_numbers<[1], [0], [0], [1], [0, 0, 1, 1], [], []>} : vector<8x128xbf16>, vector<128x128xbf16>, vector<8x128xf32> -> vector<8x128xf32>
    %c0_17 = arith.constant 0 : index
    %c0_18 = arith.constant 0 : index
    %21 = vector.load %arg8[%c0_17, %c0_18] : memref<1x128xf32, #tpu.memory_space<vmem>>, vector<1x128xf32>
    %22 = vector.broadcast %21 : vector<1x128xf32> to vector<8x128xf32>
    %23 = arith.addf %20, %22 : vector<8x128xf32>
    %c0_19 = arith.constant 0 : index
    %c0_20 = arith.constant 0 : index
    %24 = vector.load %arg9[%c0_19, %c0_20] : memref<8x128xf32, #tpu.memory_space<vmem>>, vector<8x128xf32>
    tpu.vector_store %arg9[%c0_19, %c0_20], %23 {strides = array<i32>} : memref<8x128xf32, #tpu.memory_space<vmem>>, vector<8x128xf32>,
    return
  }
  func.func @transform_0(%arg0: i32) -> (i32, i32) {
    %c0_i32 = arith.constant 0 : i32
    %c0_i32_0 = arith.constant 0 : i32
    return %arg0, %c0_i32 : i32, i32
  }
  func.func @transform_1(%arg0: i32) -> (i32, i32) {
    %c0_i32 = arith.constant 0 : i32
    %c0_i32_0 = arith.constant 0 : i32
    return %arg0, %c0_i32 : i32, i32
  }
  func.func @transform_2(%arg0: i32) -> (i32, i32) {
    %c0_i32 = arith.constant 0 : i32
    %c0_i32_0 = arith.constant 0 : i32
    %c0_i32_1 = arith.constant 0 : i32
    return %c0_i32, %c0_i32_0 : i32, i32
  }
  func.func @transform_3(%arg0: i32) -> (i32, i32) {
    %c0_i32 = arith.constant 0 : i32
    %c0_i32_0 = arith.constant 0 : i32
    %c0_i32_1 = arith.constant 0 : i32
    return %c0_i32, %c0_i32_0 : i32, i32
  }
  func.func @transform_4(%arg0: i32) -> (i32, i32) {
    %c0_i32 = arith.constant 0 : i32
    %c0_i32_0 = arith.constant 0 : i32
    %c0_i32_1 = arith.constant 0 : i32
    return %c0_i32, %c0_i32_0 : i32, i32
  }
  func.func @transform_5(%arg0: i32) -> (i32, i32) {
    %c0_i32 = arith.constant 0 : i32
    %c0_i32_0 = arith.constant 0 : i32
    %c0_i32_1 = arith.constant 0 : i32
    return %c0_i32, %c0_i32_0 : i32, i32
  }
  func.func @transform_6(%arg0: i32) -> (i32, i32) {
    %c0_i32 = arith.constant 0 : i32
    %c0_i32_0 = arith.constant 0 : i32
    %c0_i32_1 = arith.constant 0 : i32
    return %c0_i32, %c0_i32_0 : i32, i32
  }
  func.func @transform_7(%arg0: i32) -> (i32, i32) {
    %c0_i32 = arith.constant 0 : i32
    %c0_i32_0 = arith.constant 0 : i32
    %c0_i32_1 = arith.constant 0 : i32
    return %c0_i32, %c0_i32_0 : i32, i32
  }
  func.func @transform_8(%arg0: i32) -> (i32, i32) {
    %c0_i32 = arith.constant 0 : i32
    %c0_i32_0 = arith.constant 0 : i32
    return %arg0, %c0_i32 : i32, i32
  }
}

</mosaic_0001>

<bundles_post_ra>
// kernel: tpu_custom_call.1
= control target key start
LH: loop header
LB: loop body
LE: loop exit
PB: predicated region body
PF: predicated region fallthrough
CT: control target
= control target key end

     0   :  { %13 = vsyncpa [#allocation3], 0  ;;  %s916_s0 = inlined_call_operand.hbm [shape: bf16[8,128], index: 0, kind: input, shape index: {}]   ;;  %s917_s1 = inlined_call_operand.hbm [shape: f32[8,128], index: 1, kind: input, shape index: {}]   ;;  %s918_s2 = inlined_call_operand.hbm [shape: bf16[128,128], index: 2, kind: input, shape index: {}]   ;;  %s919_s3 = inlined_call_operand.vmem [shape: f32[1,128], index: 3, kind: input, shape index: {}]   ;;  %s920_s4 = inlined_call_operand.hbm [shape: bf16[128,128], index: 4, kind: input, shape index: {}]   ;;  %s921_s5 = inlined_call_operand.vmem [shape: f32[1,128], index: 5, kind: input, shape index: {}]   ;;  %s922_s6 = inlined_call_operand.hbm [shape: bf16[128,128], index: 6, kind: input, shape index: {}]   ;;  %s923_s7 = inlined_call_operand.vmem [shape: f32[1,128], index: 7, kind: input, shape index: {}]   ;;  %s924_s8 = inlined_call_operand.hbm [shape: f32[8,128], index: 8, kind: output, shape index: {}]  }
   0x1   :  { %14 = vsyncpa [#allocation6], 0 }
   0x2   :  { %15 = vsyncpa [#allocation9], 0 }
   0x3   :  { %16 = vsyncpa [#allocation4], 0  ;;  %s741_s27 = smov [#allocation5]   ;;  %s601_s9 = scalar_lea.hbm %s917_s1, 128 }
   0x4   :  { %s33_s28 = sshll.u32 %s741_s27, 4  ;;  %p602_p0 = scmp.ne.s32.totalorder %s917_s1, %s601_s9  ;;  %s34_s28 = int_to_ptr.vmem [resolvable:$true] %s33_s28 }
   0x5   :  { %p605_p1 = scmp.lt.u32.totalorder %s601_s9, %s917_s1 }
   0x7   :  { %p607_p2 = pnand %p605_p1, %p602_p0 }
   0x9   :  { %610 = shalt.err (!%p607_p2)
}
   0xa   :  { %s611_s14 = scalar_lea.vmem %s34_s28, 128  ;;  %p616_p4 = scmp.lt.s32.totalorder %s34_s28, %s34_s28 }
   0xb   :  { %p612_p3 = scmp.ne.s32.totalorder %s34_s28, %s611_s14  ;;  %p617_p5 = scmp.lt.s32.totalorder %s611_s14, %s611_s14 }
   0xd   :  { %p618_p6 = por %p617_p5, %p616_p4 }
   0xf   :  { %p619_p7 = pnand %p618_p6, %p612_p3 }
  0x11   :  { %622 = shalt.err (!%p619_p7)
}
  0x12   :  { %36 = dma.hbm_to_vmem [thread:$0]  %s917_s1, 128, %s34_s28, [#allocation6]  }
  0x13   :  { %s742_s17 = smov [#allocation8]   ;;  %s743_s19 = smov [#allocation2]  }
  0x14   :  { %s56_s18 = sshll.u32 %s742_s17, 4  ;;  %s23_s20 = sshll.u32 %s743_s19, 4  ;;  %s57_s18 = int_to_ptr.vmem [resolvable:$true] %s56_s18  ;;  %s24_s20 = int_to_ptr.vmem [resolvable:$true] %s23_s20 }
  0x15   :  { %s623_s23 = scalar_lea.hbm %s920_s4, 1024 }
  0x16   :  { %p624_p8 = scmp.ne.s32.totalorder %s920_s4, %s623_s23  ;;  %p627_p9 = scmp.lt.u32.totalorder %s623_s23, %s920_s4 }
  0x18   :  { %p629_p10 = pnand %p627_p9, %p624_p8 }
  0x1a   :  { %632 = shalt.err (!%p629_p10)
}
  0x1b   :  { %s633_s1 = scalar_lea.vmem %s57_s18, 1024  ;;  %p638_p12 = scmp.lt.s32.totalorder %s57_s18, %s57_s18 }
  0x1c   :  { %p634_p11 = scmp.ne.s32.totalorder %s57_s18, %s633_s1  ;;  %p639_p13 = scmp.lt.s32.totalorder %s633_s1, %s633_s1 }
  0x1e   :  { %p640_p0 = por %p639_p13, %p638_p12 }
  0x20   :  { %p641_p1 = pnand %p640_p0, %p634_p11 }
  0x22   :  { %644 = shalt.err (!%p641_p1)
}
  0x23   :  { %s744_s28 = smov 64   ;;  %s745_s29 = smov 4  }
  0x24   :  { %62 = dma.hbm_to_vmem [thread:$0]  %s920_s4, 1024, %s57_s18, [#allocation9], %s744_s28, %s744_s28, %s745_s29  }
  0x25   :  { %s645_s12 = scalar_lea.hbm %s916_s0, 64 }
  0x26   :  { %p646_p2 = scmp.ne.s32.totalorder %s916_s0, %s645_s12  ;;  %p649_p3 = scmp.lt.u32.totalorder %s645_s12, %s916_s0 }
  0x28   :  { %p651_p4 = pnand %p649_p3, %p646_p2 }
  0x2a   :  { %654 = shalt.err (!%p651_p4)
}
  0x2b   :  { %s655_s17 = scalar_lea.vmem %s24_s20, 64  ;;  %p660_p6 = scmp.lt.s32.totalorder %s24_s20, %s24_s20 }
  0x2c   :  { %p656_p5 = scmp.ne.s32.totalorder %s24_s20, %s655_s17  ;;  %p661_p7 = scmp.lt.s32.totalorder %s655_s17, %s655_s17 }
  0x2e   :  { %p662_p8 = por %p661_p7, %p660_p6 }
  0x30   :  { %p663_p9 = pnand %p662_p8, %p656_p5 }
  0x32   :  { %666 = shalt.err (!%p663_p9)
}
  0x33   :  { %26 = dma.hbm_to_vmem [thread:$0]  %s916_s0, 64, %s24_s20, [#allocation3]  }
  0x34   :  { %s746_s19 = smov [#allocation7]   ;;  %s747_s22 = smov [#allocation10]  }
  0x35   :  { %s42_s21 = sshll.u32 %s746_s19, 4  ;;  %s70_s23 = sshll.u32 %s747_s22, 4  ;;  %s43_s21 = int_to_ptr.vmem [resolvable:$true] %s42_s21  ;;  %s71_s23 = int_to_ptr.vmem [resolvable:$true] %s70_s23 }
  0x36   :  { %s667_s26 = scalar_lea.hbm %s918_s2, 1024 }
  0x37   :  { %p668_p10 = scmp.ne.s32.totalorder %s918_s2, %s667_s26  ;;  %p671_p11 = scmp.lt.u32.totalorder %s667_s26, %s918_s2 }
  0x39   :  { %p673_p12 = pnand %p671_p11, %p668_p10 }
  0x3b   :  { %676 = shalt.err (!%p673_p12)
}
  0x3c   :  { %s677_s0 = scalar_lea.vmem %s43_s21, 1024  ;;  %p682_p0 = scmp.lt.s32.totalorder %s43_s21, %s43_s21 }
  0x3d   :  { %p678_p13 = scmp.ne.s32.totalorder %s43_s21, %s677_s0  ;;  %p683_p1 = scmp.lt.s32.totalorder %s677_s0, %s677_s0 }
  0x3f   :  { %p684_p2 = por %p683_p1, %p682_p0 }
  0x41   :  { %p685_p3 = pnand %p684_p2, %p678_p13 }
  0x43   :  { %688 = shalt.err (!%p685_p3)
}
  0x44   :  { %48 = dma.hbm_to_vmem [thread:$0]  %s918_s2, 1024, %s43_s21, [#allocation6], %s744_s28, %s744_s28, %s745_s29  }
  0x45   :  { %s689_s13 = scalar_lea.hbm %s922_s6, 1024 }
  0x46   :  { %p690_p4 = scmp.ne.s32.totalorder %s922_s6, %s689_s13  ;;  %p693_p5 = scmp.lt.u32.totalorder %s689_s13, %s922_s6 }
  0x48   :  { %p695_p6 = pnand %p693_p5, %p690_p4 }
  0x4a   :  { %698 = shalt.err (!%p695_p6)
}
  0x4b   :  { %s699_s4 = scalar_lea.vmem %s71_s23, 1024  ;;  %p704_p8 = scmp.lt.s32.totalorder %s71_s23, %s71_s23 }
  0x4c   :  { %p700_p7 = scmp.ne.s32.totalorder %s71_s23, %s699_s4  ;;  %p705_p9 = scmp.lt.s32.totalorder %s699_s4, %s699_s4 }
  0x4e   :  { %p706_p10 = por %p705_p9, %p704_p8 }
  0x50   :  { %p707_p11 = pnand %p706_p10, %p700_p7 }
  0x52   :  { %710 = shalt.err (!%p707_p11)
}
  0x53   :  { %76 = dma.hbm_to_vmem [thread:$0]  %s922_s6, 1024, %s71_s23, [#allocation9], %s744_s28, %s744_s28, %s745_s29  }
  0x54   :  { %733 = dma.done.wait [#allocation3], 64  }
  0x55   :  { %734 = vsyncadd [#allocation3], 4294967232 }
  0x56   :  { %735 = dma.done.wait [#allocation6], 1152  }
  0x57   :  { %736 = vsyncadd [#allocation6], 4294966144 }
  0x58   :  { %737 = dma.done.wait [#allocation9], 2048  }
  0x59   :  { %738 = vsyncadd [#allocation9], 4294965248  ;;  %v748_v0 = vmov 0.0   ;;  %vm749_vm0 = vmmov 0   ;;  %v577_v1 = vld [vmem:[#allocation7] sm:$0xff]   ;;  %v578_v2 = vld [vmem:[#allocation7 + $0x8] sm:$0xff]  }
  0x5a   :  { %507 = vmatprep.subr.bf16.mxu0 %v748_v0  ;;  %523 = vmatprep.mubr.msk.bf16.mxu0 %vm749_vm0, %v748_v0  ;;  %v579_v3 = vld [vmem:[#allocation7 + $0x10] sm:$0xff]   ;;  %v585_v4 = vld [vmem:[#allocation8] sm:$0xff]   ;;  %v580_v5 = vld [vmem:[#allocation7 + $0x18] sm:$0xff]   ;;  %s750_s22 = smov [#allocation11]  }
  0x5b   :  { %527 = vmatprep.subr.bf16.mxu1 %v748_v0  ;;  %543 = vmatprep.mubr.msk.bf16.mxu1 %vm749_vm0, %v748_v0  ;;  %v586_v6 = vld [vmem:[#allocation8 + $0x8] sm:$0xff]   ;;  %v581_v7 = vld [vmem:[#allocation7 + $0x20] sm:$0xff]   ;;  %v587_v8 = vld [vmem:[#allocation8 + $0x10] sm:$0xff]   ;;  %s442_s23 = sshll.u32 %s750_s22, 4  ;;  %s443_s23 = int_to_ptr.vmem [resolvable:$true] %s442_s23 }
  0x5c   :  { %508 = vmatpush3.bf16.msra.mxu0 %v577_v1  ;;  %528 = vmatpush3.bf16.msra.mxu1 %v585_v4  ;;  %v582_v9 = vld [vmem:[#allocation7 + $0x28] sm:$0xff]   ;;  %v588_v10 = vld [vmem:[#allocation8 + $0x18] sm:$0xff]   ;;  %v583_v11 = vld [vmem:[#allocation7 + $0x30] sm:$0xff]   ;;  %p716_p13 = scmp.lt.s32.totalorder %s443_s23, %s443_s23 }
  0x5d   :  { %509 = vmatprep.subr.bf16.mxu0 %v748_v0  ;;  %529 = vmatprep.subr.bf16.mxu1 %v748_v0  ;;  %v589_v12 = vld [vmem:[#allocation8 + $0x20] sm:$0xff]   ;;  %v584_v13 = vld [vmem:[#allocation7 + $0x38] sm:$0xff]   ;;  %v590_v14 = vld [vmem:[#allocation8 + $0x28] sm:$0xff]  }
  0x5e   :  { %v95_v15 = vld [vmem:[#allocation2] sm:$0xf]  ;;  %v592_v17 = vld [vmem:[#allocation8 + $0x38] sm:$0xff]   ;;  %v593_v18 = vld [vmem:[#allocation10] sm:$0xff]  }
  0x5f   :  { %v591_v16 = vld [vmem:[#allocation8 + $0x30] sm:$0xff]   ;;  %v594_v19 = vld [vmem:[#allocation10 + $0x8] sm:$0xff]   ;;  %v596_v21 = vld [vmem:[#allocation10 + $0x18] sm:$0xff]  }
  0x60   :  { %510 = vmatpush3.bf16.msra.mxu0 %v578_v2  ;;  %530 = vmatpush3.bf16.msra.mxu1 %v586_v6  ;;  %v595_v20 = vld [vmem:[#allocation10 + $0x10] sm:$0xff]   ;;  %v597_v22 = vld [vmem:[#allocation10 + $0x20] sm:$0xff]   ;;  %v598_v23 = vld [vmem:[#allocation10 + $0x28] sm:$0xff]  }
  0x61   :  { %511 = vmatprep.subr.bf16.mxu0 %v748_v0  ;;  %531 = vmatprep.subr.bf16.mxu1 %v748_v0  ;;  %v453_v24 = vld [vmem:[%s919_s3] ss:$0 sm:$0xff]  ;;  %v207_v26 = vld [vmem:[#allocation5] sm:$0xff] }
  0x62   :  { %v599_v34 = vld [vmem:[#allocation10 + $0x30] sm:$0xff]   ;;  %v600_v35 = vld [vmem:[#allocation10 + $0x38] sm:$0xff]  }
  0x63   :  { %v462_v36 = vld [vmem:[%s921_s5] ss:$0 sm:$0xff]  ;;  %s711_s5 = scalar_lea.vmem %s443_s23, 128 }
  0x64   :  { %512 = vmatpush3.bf16.msra.mxu0 %v579_v3  ;;  %532 = vmatpush3.bf16.msra.mxu1 %v587_v8  ;;  %v471_v44 = vld [vmem:[%s923_s7] ss:$0 sm:$0xff]  ;;  %p712_p12 = scmp.ne.s32.totalorder %s443_s23, %s711_s5  ;;  %p717_p0 = scmp.lt.s32.totalorder %s711_s5, %s711_s5 }
  0x65   :  { %513 = vmatprep.subr.bf16.mxu0 %v748_v0  ;;  %533 = vmatprep.subr.bf16.mxu1 %v748_v0 }
  0x66   :  { %p718_p1 = por %p717_p0, %p716_p13 }
  0x68   :  { %514 = vmatpush3.bf16.msra.mxu0 %v580_v5  ;;  %534 = vmatpush3.bf16.msra.mxu1 %v588_v10  ;;  %p719_p2 = pnand %p718_p1, %p712_p12 }
  0x69   :  { %515 = vmatprep.subr.bf16.mxu0 %v748_v0  ;;  %535 = vmatprep.subr.bf16.mxu1 %v748_v0 }
  0x6c   :  { %516 = vmatpush3.bf16.msra.mxu0 %v581_v7  ;;  %536 = vmatpush3.bf16.msra.mxu1 %v589_v12 }
  0x6d   :  { %517 = vmatprep.subr.bf16.mxu0 %v748_v0  ;;  %537 = vmatprep.subr.bf16.mxu1 %v748_v0 }
  0x70   :  { %518 = vmatpush3.bf16.msra.mxu0 %v582_v9  ;;  %538 = vmatpush3.bf16.msra.mxu1 %v590_v14 }
  0x71   :  { %519 = vmatprep.subr.bf16.mxu0 %v748_v0  ;;  %539 = vmatprep.subr.bf16.mxu1 %v748_v0 }
  0x74   :  { %520 = vmatpush3.bf16.msra.mxu0 %v583_v11  ;;  %540 = vmatpush3.bf16.msra.mxu1 %v591_v16 }
  0x75   :  { %521 = vmatprep.subr.bf16.mxu0 %v748_v0  ;;  %541 = vmatprep.subr.bf16.mxu1 %v748_v0 }
  0x78   :  { %522 = vmatpush3.bf16.msra.mxu0 %v584_v13  ;;  %542 = vmatpush3.bf16.msra.mxu1 %v592_v17 }
  0x79   :  { %547 = vmatprep.subr.bf16.mxu0 %v748_v0 }
  0x7b   :  { %524 = vmatmul.mubr.bf16.vlgmr.msra.gmra.mrb[0].mxu0 %v95_v15 }
  0x7c   :  { %563 = vmatprep.mubr.msk.bf16.mxu0 %vm749_vm0, %v748_v0  ;;  %548 = vmatpush3.bf16.msra.mxu0 %v593_v18 }
  0x7d   :  { %549 = vmatprep.subr.bf16.mxu0 %v748_v0 }
  0x80   :  { %550 = vmatpush3.bf16.msra.mxu0 %v594_v19 }
  0x81   :  { %551 = vmatprep.subr.bf16.mxu0 %v748_v0 }
  0x84   :  { %552 = vmatpush3.bf16.msra.mxu0 %v595_v20 }
  0x85   :  { %553 = vmatprep.subr.bf16.mxu0 %v748_v0 }
  0x88   :  { %554 = vmatpush3.bf16.msra.mxu0 %v596_v21 }
  0x89   :  { %555 = vmatprep.subr.bf16.mxu0 %v748_v0 }
  0x8c   :  { %556 = vmatpush3.bf16.msra.mxu0 %v597_v22 }
  0x8d   :  { %557 = vmatprep.subr.bf16.mxu0 %v748_v0 }
  0x90   :  { %558 = vmatpush3.bf16.msra.mxu0 %v598_v23 }
  0x91   :  { %559 = vmatprep.subr.bf16.mxu0 %v748_v0 }
  0x94   :  { %560 = vmatpush3.bf16.msra.mxu0 %v599_v34 }
  0x95   :  { %561 = vmatprep.subr.bf16.mxu0 %v748_v0 }
  0x98   :  { %562 = vmatpush3.bf16.msra.mxu0 %v600_v35 }
 0x14e   :  { %v201_v25 = vpop.f32.mrb[0].mxu0 }
 0x14f   :  { %v202_v27 = vadd.f32 %v453_v24, %v201_v25  ;;  %v525_v28 = vpop.f32.mrb[1].mxu0 }
 0x150   :  { %v204_v29 = vpop.f32.mrb[2].mxu0 }
 0x151   :  { %v208_v30 = vmul.f32 %v207_v26, %v202_v27  ;;  %v526_v31 = vpop.f32.mrb[3].mxu0 }
 0x153   :  { %v209_v32 = vmax.f32 %v208_v30, 0.0 }
 0x155   :  { %v210_v33 = vpack.c.bf16 %v209_v32, %v209_v32 }
 0x157   :  { %544 = vmatmul.mubr.bf16.vlgmr.msra.gmra.mrb[0].mxu1 %v210_v33 }
 0x22a   :  { %v316_v37 = vpop.f32.mrb[0].mxu1 }
 0x22b   :  { %v317_v38 = vadd.f32 %v462_v36, %v316_v37  ;;  %v545_v39 = vpop.f32.mrb[1].mxu1 }
 0x22c   :  { %v319_v40 = vpop.f32.mrb[2].mxu1 }
 0x22d   :  { %v322_v41 = vmax.f32 %v317_v38, 0.0  ;;  %v546_v42 = vpop.f32.mrb[3].mxu1 }
 0x22f   :  { %v323_v43 = vpack.c.bf16 %v322_v41, %v322_v41 }
 0x231   :  { %564 = vmatmul.mubr.bf16.vlgmr.msra.gmra.mrb[4].mxu0 %v323_v43 }
 0x304   :  { %v429_v45 = vpop.f32.mrb[4].mxu0 }
 0x305   :  { %v430_v46 = vadd.f32 %v471_v44, %v429_v45  ;;  %v565_v47 = vpop.f32.mrb[5].mxu0 }
 0x306   :  { %v432_v48 = vpop.f32.mrb[6].mxu0 }
 0x307   :  { %435 = vst [vmem:[#allocation11] sm:$0xff] %v430_v46  ;;  %v566_v49 = vpop.f32.mrb[7].mxu0 }
 0x308   :  { %722 = shalt.err (!%p719_p2)
}
 0x309   :  { %s723_s7 = scalar_lea.hbm %s924_s8, 128 }
 0x30a   :  { %p724_p3 = scmp.ne.s32.totalorder %s924_s8, %s723_s7  ;;  %p727_p4 = scmp.lt.u32.totalorder %s723_s7, %s924_s8 }
 0x30c   :  { %p729_p5 = pnand %p727_p4, %p724_p3 }
 0x30e   :  { %732 = shalt.err (!%p729_p5)
}
 0x30f   :  { %445 = dma.vmem_to_hbm [thread:$0]  %s443_s23, 128, %s924_s8, [#allocation4]  }
 0x310   :  { %739 = dma.done.wait [#allocation4], 128  }
 0x311   :  { %740 = vsyncadd [#allocation4], 4294967168 }
 0x312   :  { %449 = vsyncpa [#allocation3], 1 }
 0x313   :  { %450 = vsyncpa [#allocation6], 1 }
 0x314   :  { %451 = vsyncpa [#allocation9], 1 }
 0x315   :  { %452 = vsyncpa [#allocation4], 1 }

</bundles_post_ra>
